<compile_context>
chip_gen: v5e
topology: v5e:2x2
jax: 0.10.0
libtpu: 0.0.40
codegen_flags: <defaults>
</compile_context>

<pallas_src>
import jax
import jax.numpy as jnp
from jax.experimental import pallas as pl
from jax.experimental.pallas import tpu as pltpu

# Logical (PyTorch) dims.
D_IN, D_H1, D_H2, D_OUT = 900, 128, 32, 2
# Lane-aligned dims used for the MXU matmuls (zero padded -> identical numerics).
D_IN_P, D_H2_P, D_OUT_P = 1024, 128, 128

MAX_TILE_B = 512


def _round_up(n, m):
    return ((n + m - 1) // m) * m


def _mlp_kernel(x_ref, w1_ref, w2_ref, w3_ref, b_ref, o_ref, xpad_ref):
    # x_ref   : (TILE_B, 900)  input dtype (f32) — streamed, unpadded
    # w1_ref  : (1024, 128), w2_ref: (128, 128), w3_ref: (128, 128)  compute dtype
    # b_ref   : (8, 128) f32; rows 0/1/2 hold (padded) b1/b2/b3
    # o_ref   : (TILE_B, 128) f32 (lane-dense; real output is columns [:2])
    # xpad_ref: (TILE_B, 1024) compute-dtype VMEM scratch (lane-aligned x tile)

    # Build the lane-aligned x tile in VMEM: real columns + zero tail.
    # Done every iteration (tail re-zero is ~100 elems/row -> negligible) so the
    # kernel has no cross-iteration state and the grid axis can be "parallel".
    xpad_ref[:, :D_IN] = x_ref[...].astype(xpad_ref.dtype)
    xpad_ref[:, D_IN:] = jnp.zeros(
        (xpad_ref.shape[0], D_IN_P - D_IN), xpad_ref.dtype)

    x = xpad_ref[...]
    b1 = b_ref[0:1, :]
    b2 = b_ref[1:2, :]
    b3 = b_ref[2:3, :]

    # Layer 1: Linear(900->128) + ReLU  (MXU matmul, f32 accumulate, f32 elementwise)
    h1 = jnp.dot(x, w1_ref[...], preferred_element_type=jnp.float32) + b1
    h1 = jnp.maximum(h1, 0.0)

    # Layer 2: Linear(128->32, padded to 128) + ReLU
    h2 = jnp.dot(h1.astype(w2_ref.dtype), w2_ref[...],
                 preferred_element_type=jnp.float32) + b2
    h2 = jnp.maximum(h2, 0.0)

    # Layer 3: Linear(32->2, padded to 128), no activation
    y = jnp.dot(h2.astype(w3_ref.dtype), w3_ref[...],
                preferred_element_type=jnp.float32) + b3
    o_ref[...] = y.astype(o_ref.dtype)


def prepare_params(params, compute_dtype=jnp.bfloat16):
    """Pad weights to lane-aligned shapes, cast MXU operands, pack biases (f32)."""
    w1, b1, w2, b2, w3, b3 = params
    w1p = jnp.zeros((D_IN_P, D_H1), compute_dtype).at[:D_IN, :].set(
        w1.astype(compute_dtype))
    w2p = jnp.zeros((D_H1, D_H2_P), compute_dtype).at[:, :D_H2].set(
        w2.astype(compute_dtype))
    w3p = jnp.zeros((D_H2_P, D_OUT_P), compute_dtype).at[:D_H2, :D_OUT].set(
        w3.astype(compute_dtype))
    bp = jnp.zeros((8, 128), jnp.float32)
    bp = bp.at[0, :D_H1].set(b1.reshape(-1).astype(jnp.float32))
    bp = bp.at[1, :D_H2].set(b2.reshape(-1).astype(jnp.float32))
    bp = bp.at[2, :D_OUT].set(b3.reshape(-1).astype(jnp.float32))
    return (w1p, w2p, w3p, bp)


def dummy_img_feat_forward(x, prepared_params, *, max_tile_b=MAX_TILE_B):
    """Pallas equivalent of DummyImgFeat.forward (image_model='gdino').

    x: (B, 900).  Returns (features, None) with features (B, 2) float32.
    """
    w1p, w2p, w3p, bp = prepared_params
    compute_dtype = w1p.dtype
    B = x.shape[0]
    assert x.shape[1] == D_IN, x.shape

    tile_b = min(max_tile_b, _round_up(B, 8))       # multiple of 8 sublanes
    b_pad = _round_up(B, tile_b)
    grid = (b_pad // tile_b,)

    # Only a (cheap, batch-dim) pad when B is ragged; no feature-dim repack pass.
    x_in = x if b_pad == B else jnp.pad(x, ((0, b_pad - B), (0, 0)))

    w_bytes = (w1p.size * w1p.dtype.itemsize
               + w2p.size * w2p.dtype.itemsize
               + w3p.size * w3p.dtype.itemsize
               + bp.size * 4)
    cost = pl.CostEstimate(
        flops=2 * b_pad * (D_IN_P * D_H1 + D_H1 * D_H2_P + D_H2_P * D_OUT_P),
        transcendentals=0,
        bytes_accessed=int(x_in.size * x_in.dtype.itemsize
                           + w_bytes
                           + b_pad * D_OUT_P * 4),
    )

    y_pad = pl.pallas_call(
        _mlp_kernel,
        out_shape=jax.ShapeDtypeStruct((b_pad, D_OUT_P), jnp.float32),
        grid=grid,
        in_specs=[
            pl.BlockSpec((tile_b, D_IN), lambda i: (i, 0)),      # x tile (streamed)
            pl.BlockSpec((D_IN_P, D_H1), lambda i: (0, 0)),      # w1 (resident)
            pl.BlockSpec((D_H1, D_H2_P), lambda i: (0, 0)),      # w2 (resident)
            pl.BlockSpec((D_H2_P, D_OUT_P), lambda i: (0, 0)),   # w3 (resident)
            pl.BlockSpec((8, 128), lambda i: (0, 0)),            # packed biases
        ],
        out_specs=pl.BlockSpec((tile_b, D_OUT_P), lambda i: (i, 0)),
        scratch_shapes=[pltpu.VMEM((tile_b, D_IN_P), compute_dtype)],
        compiler_params=pltpu.CompilerParams(
            dimension_semantics=("parallel",)),
        cost_estimate=cost,
    )(x_in, w1p, w2p, w3p, bp)

    # Lane-dense slab -> logical (B, 2).  nn.Flatten on 2-D is a no-op.
    return y_pad[:B, :D_OUT], None

    # TODO(synk): the non-'gdino' branch of DummyImgFeat is nn.Identity (trivial
    # passthrough) and the host-side U.any_to_torch_tensor device move has no
    # kernel equivalent; only the gdino MLP path is implemented here.


def init_params(key):
    """Deterministic init mimicking torch.nn.Linear's U(-1/sqrt(fan_in), 1/sqrt(fan_in))."""
    ks = jax.random.split(key, 6)

    def linear(kw, kb, fan_in, fan_out):
        bound = 1.0 / jnp.sqrt(jnp.float32(fan_in))
        w = jax.random.uniform(kw, (fan_in, fan_out), jnp.float32, -bound, bound)
        b = jax.random.uniform(kb, (fan_out,), jnp.float32, -bound, bound)
        return w, b

    w1, b1 = linear(ks[0], ks[1], D_IN, D_H1)
    w2, b2 = linear(ks[2], ks[3], D_H1, D_H2)
    w3, b3 = linear(ks[4], ks[5], D_H2, D_OUT)
    return (w1, b1, w2, b2, w3, b3)


def reference_forward(x, params):
    w1, b1, w2, b2, w3, b3 = params
    h1 = jnp.maximum(x @ w1 + b1, 0.0)
    h2 = jnp.maximum(h1 @ w2 + b2, 0.0)
    return h2 @ w3 + b3


if __name__ == "__main__":
    key = jax.random.PRNGKey(0)
    k_x, k_p = jax.random.split(key)

    B = 8
    x = jax.random.normal(k_x, (B, D_IN), dtype=jnp.float32)
    params = init_params(k_p)
    ref = reference_forward(x, params)

    # f32 path: validates kernel logic tightly against the reference.
    out_f32, aux = dummy_img_feat_forward(x, prepare_params(params, jnp.float32))
    out_f32 = jax.block_until_ready(out_f32)
    assert out_f32.shape == (B, D_OUT), out_f32.shape
    assert aux is None
    assert jnp.allclose(out_f32, ref, atol=1e-4, rtol=1e-4), \
        float(jnp.max(jnp.abs(out_f32 - ref)))

    # bf16 MXU-operand path (the perf configuration): looser tolerance.
    out_bf16, _ = dummy_img_feat_forward(x, prepare_params(params, jnp.bfloat16))
    out_bf16 = jax.block_until_ready(out_bf16)
    assert jnp.allclose(out_bf16, ref, atol=3e-2, rtol=3e-2), \
        float(jnp.max(jnp.abs(out_bf16 - ref)))

    # Ragged batch (B not a multiple of the tile) exercises the padding path.
    B2 = 5
    x2 = jax.random.normal(jax.random.PRNGKey(1), (B2, D_IN), dtype=jnp.float32)
    out2, _ = dummy_img_feat_forward(x2, prepare_params(params, jnp.float32))
    out2 = jax.block_until_ready(out2)
    assert out2.shape == (B2, D_OUT)
    assert jnp.allclose(out2, reference_forward(x2, params), atol=1e-4, rtol=1e-4)

    print("KERNEL_OK")
</pallas_src>

<mosaic_0001>
module attributes {stable_mosaic.version = 11 : i64} {
  func.func @_mlp_kernel(%arg0: i32, %arg1: memref<8x900xf32, #tpu.memory_space<vmem>>, %arg2: memref<1024x128xf32, #tpu.memory_space<vmem>>, %arg3: memref<128x128xf32, #tpu.memory_space<vmem>>, %arg4: memref<128x128xf32, #tpu.memory_space<vmem>>, %arg5: memref<8x128xf32, #tpu.memory_space<vmem>>, %arg6: memref<8x128xf32, #tpu.memory_space<vmem>>, %arg7: memref<8x1024xf32, #tpu.memory_space<vmem>>) attributes {dimension_semantics = [#tpu.dimension_semantics<parallel>], iteration_bounds = array<i64: 1>, scalar_prefetch = 0 : i64, scratch_operands = 1 : i64, tpu.core_type = #tpu.core_type<tc>, window_params = [{transform_indices = @transform_0, window_bounds = array<i64: 8, 900>}, {pipeline_mode = #tpu.pipeline_mode<synchronous>, transform_indices = @transform_1, window_bounds = array<i64: 1024, 128>}, {pipeline_mode = #tpu.pipeline_mode<synchronous>, transform_indices = @transform_2, window_bounds = array<i64: 128, 128>}, {pipeline_mode = #tpu.pipeline_mode<synchronous>, transform_indices = @transform_3, window_bounds = array<i64: 128, 128>}, {pipeline_mode = #tpu.pipeline_mode<synchronous>, transform_indices = @transform_4, window_bounds = array<i64: 8, 128>}, {transform_indices = @transform_5, window_bounds = array<i64: 8, 128>}]} {
    %c0 = arith.constant 0 : index
    %c0_0 = arith.constant 0 : index
    %0 = vector.load %arg1[%c0, %c0_0] : memref<8x900xf32, #tpu.memory_space<vmem>>, vector<8x900xf32>
    %c0_1 = arith.constant 0 : index
    %c0_2 = arith.constant 0 : index
    %1 = vector.load %arg7[%c0_1, %c0_2] : memref<8x1024xf32, #tpu.memory_space<vmem>>, vector<8x900xf32>
    tpu.vector_store %arg7[%c0_1, %c0_2], %0 {strides = array<i32>} : memref<8x1024xf32, #tpu.memory_space<vmem>>, vector<8x900xf32>,
    %cst = arith.constant 0.000000e+00 : f32
    %2 = vector.broadcast %cst : f32 to vector<8x124xf32>
    %c0_3 = arith.constant 0 : index
    %c900 = arith.constant 900 : index
    %3 = vector.load %arg7[%c0_3, %c900] : memref<8x1024xf32, #tpu.memory_space<vmem>>, vector<8x124xf32>
    tpu.vector_store %arg7[%c0_3, %c900], %2 {strides = array<i32>} : memref<8x1024xf32, #tpu.memory_space<vmem>>, vector<8x124xf32>,
    %c0_4 = arith.constant 0 : index
    %c0_5 = arith.constant 0 : index
    %4 = vector.load %arg7[%c0_4, %c0_5] : memref<8x1024xf32, #tpu.memory_space<vmem>>, vector<8x1024xf32>
    %c0_6 = arith.constant 0 : index
    %c0_7 = arith.constant 0 : index
    %5 = vector.load %arg5[%c0_6, %c0_7] : memref<8x128xf32, #tpu.memory_space<vmem>>, vector<1x128xf32>
    %c1 = arith.constant 1 : index
    %c0_8 = arith.constant 0 : index
    %6 = vector.load %arg5[%c1, %c0_8] : memref<8x128xf32, #tpu.memory_space<vmem>>, vector<1x128xf32>
    %c2 = arith.constant 2 : index
    %c0_9 = arith.constant 0 : index
    %7 = vector.load %arg5[%c2, %c0_9] : memref<8x128xf32, #tpu.memory_space<vmem>>, vector<1x128xf32>
    %c0_10 = arith.constant 0 : index
    %c0_11 = arith.constant 0 : index
    %8 = vector.load %arg2[%c0_10, %c0_11] : memref<1024x128xf32, #tpu.memory_space<vmem>>, vector<1024x128xf32>
    %cst_12 = arith.constant dense<0.000000e+00> : vector<8x128xf32>
    %9 = tpu.matmul %4, %8, %cst_12 {dimension_numbers = #tpu.dot_dimension_numbers<[1], [0], [0], [1], [0, 0, 1, 1], [], []>} : vector<8x1024xf32>, vector<1024x128xf32>, vector<8x128xf32> -> vector<8x128xf32>
    %10 = vector.broadcast %5 : vector<1x128xf32> to vector<8x128xf32>
    %11 = arith.addf %9, %10 : vector<8x128xf32>
    %cst_13 = arith.constant 0.000000e+00 : f32
    %12 = vector.broadcast %cst_13 : f32 to vector<8x128xf32>
    %13 = arith.maximumf %11, %12 : vector<8x128xf32>
    %c0_14 = arith.constant 0 : index
    %c0_15 = arith.constant 0 : index
    %14 = vector.load %arg3[%c0_14, %c0_15] : memref<128x128xf32, #tpu.memory_space<vmem>>, vector<128x128xf32>
    %cst_16 = arith.constant dense<0.000000e+00> : vector<8x128xf32>
    %15 = tpu.matmul %13, %14, %cst_16 {dimension_numbers = #tpu.dot_dimension_numbers<[1], [0], [0], [1], [0, 0, 1, 1], [], []>} : vector<8x128xf32>, vector<128x128xf32>, vector<8x128xf32> -> vector<8x128xf32>
    %16 = vector.broadcast %6 : vector<1x128xf32> to vector<8x128xf32>
    %17 = arith.addf %15, %16 : vector<8x128xf32>
    %cst_17 = arith.constant 0.000000e+00 : f32
    %18 = vector.broadcast %cst_17 : f32 to vector<8x128xf32>
    %19 = arith.maximumf %17, %18 : vector<8x128xf32>
    %c0_18 = arith.constant 0 : index
    %c0_19 = arith.constant 0 : index
    %20 = vector.load %arg4[%c0_18, %c0_19] : memref<128x128xf32, #tpu.memory_space<vmem>>, vector<128x128xf32>
    %cst_20 = arith.constant dense<0.000000e+00> : vector<8x128xf32>
    %21 = tpu.matmul %19, %20, %cst_20 {dimension_numbers = #tpu.dot_dimension_numbers<[1], [0], [0], [1], [0, 0, 1, 1], [], []>} : vector<8x128xf32>, vector<128x128xf32>, vector<8x128xf32> -> vector<8x128xf32>
    %22 = vector.broadcast %7 : vector<1x128xf32> to vector<8x128xf32>
    %23 = arith.addf %21, %22 : vector<8x128xf32>
    %c0_21 = arith.constant 0 : index
    %c0_22 = arith.constant 0 : index
    %24 = vector.load %arg6[%c0_21, %c0_22] : memref<8x128xf32, #tpu.memory_space<vmem>>, vector<8x128xf32>
    tpu.vector_store %arg6[%c0_21, %c0_22], %23 {strides = array<i32>} : memref<8x128xf32, #tpu.memory_space<vmem>>, vector<8x128xf32>,
    return
  }
  func.func @transform_0(%arg0: i32) -> (i32, i32) {
    %c0_i32 = arith.constant 0 : i32
    %c0_i32_0 = arith.constant 0 : i32
    return %arg0, %c0_i32 : i32, i32
  }
  func.func @transform_1(%arg0: i32) -> (i32, i32) {
    %c0_i32 = arith.constant 0 : i32
    %c0_i32_0 = arith.constant 0 : i32
    %c0_i32_1 = arith.constant 0 : i32
    return %c0_i32, %c0_i32_0 : i32, i32
  }
  func.func @transform_2(%arg0: i32) -> (i32, i32) {
    %c0_i32 = arith.constant 0 : i32
    %c0_i32_0 = arith.constant 0 : i32
    %c0_i32_1 = arith.constant 0 : i32
    return %c0_i32, %c0_i32_0 : i32, i32
  }
  func.func @transform_3(%arg0: i32) -> (i32, i32) {
    %c0_i32 = arith.constant 0 : i32
    %c0_i32_0 = arith.constant 0 : i32
    %c0_i32_1 = arith.constant 0 : i32
    return %c0_i32, %c0_i32_0 : i32, i32
  }
  func.func @transform_4(%arg0: i32) -> (i32, i32) {
    %c0_i32 = arith.constant 0 : i32
    %c0_i32_0 = arith.constant 0 : i32
    %c0_i32_1 = arith.constant 0 : i32
    return %c0_i32, %c0_i32_0 : i32, i32
  }
  func.func @transform_5(%arg0: i32) -> (i32, i32) {
    %c0_i32 = arith.constant 0 : i32
    %c0_i32_0 = arith.constant 0 : i32
    return %arg0, %c0_i32 : i32, i32
  }
}

</mosaic_0001>

<bundles_post_ra>
// kernel: tpu_custom_call.1
= control target key start
LH: loop header
LB: loop body
LE: loop exit
PB: predicated region body
PF: predicated region fallthrough
CT: control target
= control target key end

     0   :  { %10 = vsyncpa [#allocation4], 0  ;;  %s754_s0 = inlined_call_operand.hbm [shape: f32[8,900], index: 0, kind: input, shape index: {}]   ;;  %s755_s1 = inlined_call_operand.hbm [shape: f32[1024,128], index: 1, kind: input, shape index: {}]   ;;  %s756_s2 = inlined_call_operand.hbm [shape: f32[128,128], index: 2, kind: input, shape index: {}]   ;;  %s757_s3 = inlined_call_operand.hbm [shape: f32[128,128], index: 3, kind: input, shape index: {}]   ;;  %s758_s4 = inlined_call_operand.hbm [shape: f32[8,128], index: 4, kind: input, shape index: {}]   ;;  %s759_s5 = inlined_call_operand.hbm [shape: f32[8,128], index: 5, kind: output, shape index: {}]  }
   0x1   :  { %11 = vsyncpa [#allocation7], 0 }
   0x2   :  { %12 = vsyncpa [#allocation10], 0  ;;  %s29_s20 = sshll.u32 %s755_s1, 4  ;;  %s30_s20 = int_to_ptr.hbm [resolvable:$true] %s29_s20 }
   0x3   :  { %13 = vsyncpa [#allocation5], 0  ;;  %s674_s21 = smov [#allocation6]   ;;  %s55_s25 = sshll.u32 %s757_s3, 4  ;;  %s56_s25 = int_to_ptr.hbm [resolvable:$true] %s55_s25 }
   0x4   :  { %s31_s22 = sshll.u32 %s674_s21, 4  ;;  %s675_s26 = smov 128   ;;  %s32_s22 = int_to_ptr.vmem [resolvable:$true] %s31_s22 }
   0x5   :  { %s676_s27 = smov 8   ;;  %s677_s28 = smov [#allocation9]  }
   0x6   :  { %37 = dma.hbm_to_vmem [thread:$0]  %s30_s20, 16384, %s32_s22, [#allocation7], %s675_s26, %s675_s26, %s676_s27  }
   0x7   :  { %s57_s29 = sshll.u32 %s677_s28, 4  ;;  %s19_s7 = sshll.u32 %s754_s0, 4  ;;  %s58_s29 = int_to_ptr.vmem [resolvable:$true] %s57_s29  ;;  %s20_s7 = int_to_ptr.hbm [resolvable:$true] %s19_s7 }
   0x8   :  { %63 = dma.hbm_to_vmem [thread:$0]  %s56_s25, 2048, %s58_s29, [#allocation10], %s675_s26, %s675_s26, %s676_s27  }
   0x9   :  { %s42_s9 = sshll.u32 %s756_s2, 4  ;;  %s678_s10 = smov [#allocation3]   ;;  %s43_s9 = int_to_ptr.hbm [resolvable:$true] %s42_s9 }
   0xa   :  { %s21_s11 = sshll.u32 %s678_s10, 4  ;;  %s679_s3 = smov [#allocation8]   ;;  %s22_s11 = int_to_ptr.vmem [resolvable:$true] %s21_s11 }
   0xb   :  { %24 = dma.hbm_to_vmem [thread:$0]  %s20_s7, 1024, %s22_s11, [#allocation4]  }
   0xc   :  { %s44_s12 = sshll.u32 %s679_s3, 4  ;;  %s69_s15 = sshll.u32 %s758_s4, 4  ;;  %s45_s12 = int_to_ptr.vmem [resolvable:$true] %s44_s12  ;;  %s70_s15 = int_to_ptr.hbm [resolvable:$true] %s69_s15 }
   0xd   :  { %50 = dma.hbm_to_vmem [thread:$0]  %s43_s9, 2048, %s45_s12, [#allocation7], %s675_s26, %s675_s26, %s676_s27  }
   0xe   :  { %s680_s0 = smov [#allocation11]  }
   0xf   :  { %s71_s16 = sshll.u32 %s680_s0, 4  ;;  %s72_s16 = int_to_ptr.vmem [resolvable:$true] %s71_s16 }
  0x10   :  { %74 = dma.hbm_to_vmem [thread:$0]  %s70_s15, 128, %s72_s16, [#allocation10]  }
  0x11   :  { %666 = dma.done.wait [#allocation4], 1024  }
  0x12   :  { %667 = vsyncadd [#allocation4], 4294966272 }
  0x13   :  { %668 = dma.done.wait [#allocation7], 18432  }
  0x14   :  { %669 = vsyncadd [#allocation7], 4294948864 }
  0x15   :  { %670 = dma.done.wait [#allocation10], 2176  }
  0x16   :  { %671 = vsyncadd [#allocation10], 4294965120  ;;  %v172_v0 = vld [vmem:[#allocation6 + $0x178] sm:$0xff]  ;;  %v171_v2 = vld [vmem:[#allocation6 + $0x170] sm:$0xff]  ;;  %vm110_vm0 = vcmask 31744   ;;  %vm112_vm1 = vcmask 1047584  }
  0x17   :  { %v140_v1 = vld [vmem:[#allocation6 + $0x78] sm:$0xff]  ;;  %294 = vmatpush.msra.mxu2 %v172_v0  ;;  %v139_v4 = vld [vmem:[#allocation6 + $0x70] sm:$0xff]  ;;  %v170_v6 = vld [vmem:[#allocation6 + $0x168] sm:$0xff]  ;;  %s682_s2 = smov [#allocation12]   ;;  %s498_s19 = sshll.u32 %s759_s5, 4  ;;  %s499_s19 = int_to_ptr.hbm [resolvable:$true] %s498_s19 }
  0x18   :  { %254 = vmatpush.msra.mxu0 %v140_v1  ;;  %v188_v3 = vld [vmem:[#allocation6 + $0x1f8] sm:$0xff]  ;;  %v187_v7 = vld [vmem:[#allocation6 + $0x1f0] sm:$0xff]  ;;  %v138_v8 = vld [vmem:[#allocation6 + $0x68] sm:$0xff]  ;;  %s496_s4 = sshll.u32 %s682_s2, 4  ;;  %s497_s4 = int_to_ptr.vmem [resolvable:$true] %s496_s4 }
  0x19   :  { %v156_v5 = vld [vmem:[#allocation6 + $0xf8] sm:$0xff]  ;;  %314 = vmatpush.msra.mxu3 %v188_v3  ;;  %295 = vmatpush.msra.mxu2 %v171_v2  ;;  %v155_v9 = vld [vmem:[#allocation6 + $0xf0] sm:$0xff]  ;;  %v186_v10 = vld [vmem:[#allocation6 + $0x1e8] sm:$0xff] }
  0x1a   :  { %274 = vmatpush.msra.mxu1 %v156_v5  ;;  %255 = vmatpush.msra.mxu0 %v139_v4  ;;  %v169_v11 = vld [vmem:[#allocation6 + $0x160] sm:$0xff]  ;;  %v154_v13 = vld [vmem:[#allocation6 + $0xe8] sm:$0xff]  ;;  %v168_v16 = vld [vmem:[#allocation6 + $0x158] sm:$0xff] }
  0x1b   :  { %315 = vmatpush.msra.mxu3 %v187_v7  ;;  %v137_v12 = vld [vmem:[#allocation6 + $0x60] sm:$0xff]  ;;  %296 = vmatpush.msra.mxu2 %v170_v6  ;;  %v136_v17 = vld [vmem:[#allocation6 + $0x58] sm:$0xff]  ;;  %v167_v20 = vld [vmem:[#allocation6 + $0x150] sm:$0xff] }
  0x1c   :  { %275 = vmatpush.msra.mxu1 %v155_v9  ;;  %256 = vmatpush.msra.mxu0 %v138_v8  ;;  %v185_v14 = vld [vmem:[#allocation6 + $0x1e0] sm:$0xff]  ;;  %v184_v18 = vld [vmem:[#allocation6 + $0x1d8] sm:$0xff]  ;;  %v135_v21 = vld [vmem:[#allocation6 + $0x50] sm:$0xff] }
  0x1d   :  { %v153_v15 = vld [vmem:[#allocation6 + $0xe0] sm:$0xff]  ;;  %316 = vmatpush.msra.mxu3 %v186_v10  ;;  %297 = vmatpush.msra.mxu2 %v169_v11  ;;  %v152_v19 = vld [vmem:[#allocation6 + $0xd8] sm:$0xff]  ;;  %v183_v22 = vld [vmem:[#allocation6 + $0x1d0] sm:$0xff] }
  0x1e   :  { %276 = vmatpush.msra.mxu1 %v154_v13  ;;  %257 = vmatpush.msra.mxu0 %v137_v12  ;;  %v151_v23 = vld [vmem:[#allocation6 + $0xd0] sm:$0xff]  ;;  %v166_v24 = vld [vmem:[#allocation6 + $0x148] sm:$0xff]  ;;  %v165_v28 = vld [vmem:[#allocation6 + $0x140] sm:$0xff] }
  0x1f   :  { %317 = vmatpush.msra.mxu3 %v185_v14  ;;  %298 = vmatpush.msra.mxu2 %v168_v16  ;;  %v134_v25 = vld [vmem:[#allocation6 + $0x48] sm:$0xff]  ;;  %v133_v29 = vld [vmem:[#allocation6 + $0x40] sm:$0xff]  ;;  %v164_v32 = vld [vmem:[#allocation6 + $0x138] sm:$0xff] }
  0x20   :  { %277 = vmatpush.msra.mxu1 %v153_v15  ;;  %258 = vmatpush.msra.mxu0 %v136_v17  ;;  %v182_v26 = vld [vmem:[#allocation6 + $0x1c8] sm:$0xff]  ;;  %v181_v30 = vld [vmem:[#allocation6 + $0x1c0] sm:$0xff]  ;;  %v132_v33 = vld [vmem:[#allocation6 + $0x38] sm:$0xff] }
  0x21   :  { %318 = vmatpush.msra.mxu3 %v184_v18  ;;  %299 = vmatpush.msra.mxu2 %v167_v20  ;;  %v150_v27 = vld [vmem:[#allocation6 + $0xc8] sm:$0xff]  ;;  %v149_v31 = vld [vmem:[#allocation6 + $0xc0] sm:$0xff]  ;;  %v180_v34 = vld [vmem:[#allocation6 + $0x1b8] sm:$0xff] }
  0x22   :  { %278 = vmatpush.msra.mxu1 %v152_v19  ;;  %259 = vmatpush.msra.mxu0 %v135_v21  ;;  %v148_v35 = vld [vmem:[#allocation6 + $0xb8] sm:$0xff]  ;;  %v163_v36 = vld [vmem:[#allocation6 + $0x130] sm:$0xff]  ;;  %v162_v40 = vld [vmem:[#allocation6 + $0x128] sm:$0xff] }
  0x23   :  { %319 = vmatpush.msra.mxu3 %v183_v22  ;;  %300 = vmatpush.msra.mxu2 %v166_v24  ;;  %v131_v37 = vld [vmem:[#allocation6 + $0x30] sm:$0xff]  ;;  %v130_v41 = vld [vmem:[#allocation6 + $0x28] sm:$0xff]  ;;  %v161_v44 = vld [vmem:[#allocation6 + $0x120] sm:$0xff] }
  0x24   :  { %279 = vmatpush.msra.mxu1 %v151_v23  ;;  %260 = vmatpush.msra.mxu0 %v134_v25  ;;  %v179_v38 = vld [vmem:[#allocation6 + $0x1b0] sm:$0xff]  ;;  %v178_v42 = vld [vmem:[#allocation6 + $0x1a8] sm:$0xff]  ;;  %v129_v45 = vld [vmem:[#allocation6 + $0x20] sm:$0xff] }
  0x25   :  { %320 = vmatpush.msra.mxu3 %v182_v26  ;;  %301 = vmatpush.msra.mxu2 %v165_v28  ;;  %v147_v39 = vld [vmem:[#allocation6 + $0xb0] sm:$0xff]  ;;  %v146_v43 = vld [vmem:[#allocation6 + $0xa8] sm:$0xff]  ;;  %v177_v46 = vld [vmem:[#allocation6 + $0x1a0] sm:$0xff] }
  0x26   :  { %280 = vmatpush.msra.mxu1 %v150_v27  ;;  %261 = vmatpush.msra.mxu0 %v133_v29  ;;  %v145_v47 = vld [vmem:[#allocation6 + $0xa0] sm:$0xff]  ;;  %v160_v48 = vld [vmem:[#allocation6 + $0x118] sm:$0xff]  ;;  %v159_v52 = vld [vmem:[#allocation6 + $0x110] sm:$0xff] }
  0x27   :  { %321 = vmatpush.msra.mxu3 %v181_v30  ;;  %302 = vmatpush.msra.mxu2 %v164_v32  ;;  %v128_v49 = vld [vmem:[#allocation6 + $0x18] sm:$0xff]  ;;  %v127_v53 = vld [vmem:[#allocation6 + $0x10] sm:$0xff]  ;;  %v158_v56 = vld [vmem:[#allocation6 + $0x108] sm:$0xff] }
  0x28   :  { %281 = vmatpush.msra.mxu1 %v149_v31  ;;  %262 = vmatpush.msra.mxu0 %v132_v33  ;;  %v176_v50 = vld [vmem:[#allocation6 + $0x198] sm:$0xff]  ;;  %v175_v54 = vld [vmem:[#allocation6 + $0x190] sm:$0xff]  ;;  %v126_v57 = vld [vmem:[#allocation6 + $0x8] sm:$0xff] }
  0x29   :  { %322 = vmatpush.msra.mxu3 %v180_v34  ;;  %303 = vmatpush.msra.mxu2 %v163_v36  ;;  %v144_v51 = vld [vmem:[#allocation6 + $0x98] sm:$0xff]  ;;  %v143_v55 = vld [vmem:[#allocation6 + $0x90] sm:$0xff]  ;;  %v174_v58 = vld [vmem:[#allocation6 + $0x188] sm:$0xff] }
  0x2a   :  { %282 = vmatpush.msra.mxu1 %v148_v35  ;;  %263 = vmatpush.msra.mxu0 %v131_v37  ;;  %v142_v59 = vld [vmem:[#allocation6 + $0x88] sm:$0xff]  ;;  %v157_v60 = vld [vmem:[#allocation6 + $0x100] sm:$0xff]  ;;  %v236_v62 = vld [vmem:[#allocation6 + $0x378] sm:$0xff] }
  0x2b   :  { %323 = vmatpush.msra.mxu3 %v179_v38  ;;  %304 = vmatpush.msra.mxu2 %v162_v40  ;;  %v125_v61 = vld [vmem:[#allocation6] sm:$0xff]  ;;  %v204_v0 = vld [vmem:[#allocation6 + $0x278] sm:$0xff]  ;;  %v235_v2 = vld [vmem:[#allocation6 + $0x370] sm:$0xff] }
  0x2c   :  { %283 = vmatpush.msra.mxu1 %v147_v39  ;;  %264 = vmatpush.msra.mxu0 %v130_v41  ;;  %v173_v63 = vld [vmem:[#allocation6 + $0x180] sm:$0xff]  ;;  %v252_v1 = vld [vmem:[#allocation6 + $0x3f8] sm:$0xff]  ;;  %v203_v4 = vld [vmem:[#allocation6 + $0x270] sm:$0xff] }
  0x2d   :  { %324 = vmatpush.msra.mxu3 %v178_v42  ;;  %305 = vmatpush.msra.mxu2 %v161_v44  ;;  %v141_v3 = vld [vmem:[#allocation6 + $0x80] sm:$0xff]  ;;  %v220_v5 = vld [vmem:[#allocation6 + $0x2f8] sm:$0xff]  ;;  %v234_v6 = vld [vmem:[#allocation6 + $0x368] sm:$0xff]  ;;  %v681_v44 = vmov 0.0  }
  0x2e   :  { %284 = vmatpush.msra.mxu1 %v146_v43  ;;  %265 = vmatpush.msra.mxu0 %v129_v45  ;;  %v251_v7 = vld [vmem:[#allocation6 + $0x3f0] sm:$0xff]  ;;  %v202_v8 = vld [vmem:[#allocation6 + $0x268] sm:$0xff]  ;;  %v233_v10 = vld [vmem:[#allocation6 + $0x360] sm:$0xff] }
  0x2f   :  { %325 = vmatpush.msra.mxu3 %v177_v46  ;;  %306 = vmatpush.msra.mxu2 %v160_v48  ;;  %v219_v9 = vld [vmem:[#allocation6 + $0x2f0] sm:$0xff]  ;;  %v250_v11 = vld [vmem:[#allocation6 + $0x3e8] sm:$0xff]  ;;  %v201_v12 = vld [vmem:[#allocation6 + $0x260] sm:$0xff] }
  0x30   :  { %285 = vmatpush.msra.mxu1 %v145_v47  ;;  %266 = vmatpush.msra.mxu0 %v128_v49  ;;  %v218_v13 = vld [vmem:[#allocation6 + $0x2e8] sm:$0xff]  ;;  %v728_v14 = vld [vmem:[#allocation3 + $0x10] sm:$0xff]  ;;  %v232_v15 = vld [vmem:[#allocation6 + $0x358] sm:$0xff] }
  0x31   :  { %326 = vmatpush.msra.mxu3 %v176_v50  ;;  %307 = vmatpush.msra.mxu2 %v159_v52  ;;  %v249_v16 = vld [vmem:[#allocation6 + $0x3e0] sm:$0xff]  ;;  %v200_v18 = vld [vmem:[#allocation6 + $0x258] sm:$0xff]  ;;  %v231_v21 = vld [vmem:[#allocation6 + $0x350] sm:$0xff] }
  0x32   :  { %286 = vmatpush.msra.mxu1 %v144_v51  ;;  %267 = vmatpush.msra.mxu0 %v127_v53  ;;  %v730_v17 = vld [vmem:[#allocation3] sm:$0xff]  ;;  %v732_v20 = vld [vmem:[#allocation3 + $0x18] sm:$0xff]  ;;  %v734_v23 = vld [vmem:[#allocation3 + $0x8] sm:$0xff] }
  0x33   :  { %327 = vmatpush.msra.mxu3 %v175_v54  ;;  %308 = vmatpush.msra.mxu2 %v158_v56  ;;  %v217_v19 = vld [vmem:[#allocation6 + $0x2e0] sm:$0xff]  ;;  %v248_v22 = vld [vmem:[#allocation6 + $0x3d8] sm:$0xff]  ;;  %v199_v24 = vld [vmem:[#allocation6 + $0x250] sm:$0xff] }
  0x34   :  { %287 = vmatpush.msra.mxu1 %v143_v55  ;;  %268 = vmatpush.msra.mxu0 %v126_v57  ;;  %v216_v25 = vld [vmem:[#allocation6 + $0x2d8] sm:$0xff]  ;;  %v230_v26 = vld [vmem:[#allocation6 + $0x348] sm:$0xff]  ;;  %v247_v27 = vld [vmem:[#allocation6 + $0x3d0] sm:$0xff] }
  0x35   :  { %328 = vmatpush.msra.mxu3 %v174_v58  ;;  %309 = vmatpush.msra.mxu2 %v157_v60  ;;  %v198_v28 = vld [vmem:[#allocation6 + $0x248] sm:$0xff]  ;;  %v215_v29 = vld [vmem:[#allocation6 + $0x2d0] sm:$0xff]  ;;  %v229_v31 = vld [vmem:[#allocation6 + $0x340] sm:$0xff] }
  0x36   :  { %288 = vmatpush.msra.mxu1 %v142_v59  ;;  %269 = vmatpush.msra.mxu0 %v125_v61  ;;  %v736_v30 = vld [vmem:[#allocation3 + $0x30] sm:$0xff]  ;;  %v246_v32 = vld [vmem:[#allocation6 + $0x3c8] sm:$0xff]  ;;  %v197_v33 = vld [vmem:[#allocation6 + $0x240] sm:$0xff] }
  0x37   :  { %374 = vmatpush.msrb.mxu2 %v236_v62  ;;  %329 = vmatpush.msra.mxu3 %v173_v63  ;;  %v214_v34 = vld [vmem:[#allocation6 + $0x2c8] sm:$0xff]  ;;  %v738_v35 = vld [vmem:[#allocation3 + $0x20] sm:$0xff]  ;;  %v102_v36 = vld [vmem:[#allocation3 + $0x38] sm:$0xff] }
  0x38   :  { %334 = vmatpush.msrb.mxu0 %v204_v0  ;;  %289 = vmatpush.msra.mxu1 %v141_v3  ;;  %v228_v37 = vld [vmem:[#allocation6 + $0x338] sm:$0xff]  ;;  %v245_v38 = vld [vmem:[#allocation6 + $0x3c0] sm:$0xff]  ;;  %v227_v41 = vld [vmem:[#allocation6 + $0x330] sm:$0xff]  ;;  %111 = vst.msk [vmem:[#allocation2 + $0x38] sm:$0xff] %vm110_vm0, %v102_v36 }
  0x39   :  { %394 = vmatpush.msrb.mxu3 %v252_v1  ;;  %375 = vmatpush.msrb.mxu2 %v235_v2  ;;  %v196_v39 = vld [vmem:[#allocation6 + $0x238] sm:$0xff]  ;;  %v213_v40 = vld [vmem:[#allocation6 + $0x2c0] sm:$0xff]  ;;  %v195_v43 = vld [vmem:[#allocation6 + $0x230] sm:$0xff]  ;;  %113 = vst.msk [vmem:[#allocation2 + $0x38] sm:$0xff] %vm112_vm1, %v681_v44 }
  0x3a   :  { %335 = vmatpush.msrb.mxu0 %v203_v4  ;;  %354 = vmatpush.msrb.mxu1 %v220_v5  ;;  %v244_v42 = vld [vmem:[#allocation6 + $0x3b8] sm:$0xff]  ;;  %v742_v45 = vld [vmem:[#allocation3 + $0x28] sm:$0xff]  ;;  %v243_v48 = vld [vmem:[#allocation6 + $0x3b0] sm:$0xff] }
  0x3b   :  { %376 = vmatpush.msrb.mxu2 %v234_v6  ;;  %395 = vmatpush.msrb.mxu3 %v251_v7  ;;  %v212_v46 = vld [vmem:[#allocation6 + $0x2b8] sm:$0xff]  ;;  %v226_v47 = vld [vmem:[#allocation6 + $0x328] sm:$0xff]  ;;  %v211_v50 = vld [vmem:[#allocation6 + $0x2b0] sm:$0xff] }
  0x3c   :  { %336 = vmatpush.msrb.mxu0 %v202_v8  ;;  %355 = vmatpush.msrb.mxu1 %v219_v9  ;;  %v194_v49 = vld [vmem:[#allocation6 + $0x228] sm:$0xff]  ;;  %v225_v51 = vld [vmem:[#allocation6 + $0x320] sm:$0xff]  ;;  %v224_v55 = vld [vmem:[#allocation6 + $0x318] sm:$0xff] }
  0x3d   :  { %377 = vmatpush.msrb.mxu2 %v233_v10  ;;  %396 = vmatpush.msrb.mxu3 %v250_v11  ;;  %v242_v52 = vld [vmem:[#allocation6 + $0x3a8] sm:$0xff]  ;;  %v193_v53 = vld [vmem:[#allocation6 + $0x220] sm:$0xff]  ;;  %v192_v57 = vld [vmem:[#allocation6 + $0x218] sm:$0xff] }
  0x3e   :  { %337 = vmatpush.msrb.mxu0 %v201_v12  ;;  %356 = vmatpush.msrb.mxu1 %v218_v13  ;;  %v210_v54 = vld [vmem:[#allocation6 + $0x2a8] sm:$0xff]  ;;  %v241_v56 = vld [vmem:[#allocation6 + $0x3a0] sm:$0xff]  ;;  %v223_v59 = vld [vmem:[#allocation6 + $0x310] sm:$0xff] }
  0x3f   :  { %378 = vmatpush.msrb.mxu2 %v232_v15  ;;  %397 = vmatpush.msrb.mxu3 %v249_v16  ;;  %v209_v58 = vld [vmem:[#allocation6 + $0x2a0] sm:$0xff]  ;;  %v240_v60 = vld [vmem:[#allocation6 + $0x398] sm:$0xff]  ;;  %v191_v61 = vld [vmem:[#allocation6 + $0x210] sm:$0xff] }
  0x40   :  { %338 = vmatpush.msrb.mxu0 %v200_v18  ;;  %357 = vmatpush.msrb.mxu1 %v217_v19  ;;  %v208_v62 = vld [vmem:[#allocation6 + $0x298] sm:$0xff]  ;;  %v222_v63 = vld [vmem:[#allocation6 + $0x308] sm:$0xff]  ;;  %v239_v0 = vld [vmem:[#allocation6 + $0x390] sm:$0xff] }
  0x41   :  { %379 = vmatpush.msrb.mxu2 %v231_v21  ;;  %398 = vmatpush.msrb.mxu3 %v248_v22  ;;  %v190_v1 = vld [vmem:[#allocation6 + $0x208] sm:$0xff]  ;;  %v207_v2 = vld [vmem:[#allocation6 + $0x290] sm:$0xff]  ;;  %v221_v3 = vld [vmem:[#allocation6 + $0x300] sm:$0xff] }
  0x42   :  { %339 = vmatpush.msrb.mxu0 %v199_v24  ;;  %358 = vmatpush.msrb.mxu1 %v216_v25  ;;  %v238_v4 = vld [vmem:[#allocation6 + $0x388] sm:$0xff]  ;;  %v189_v5 = vld [vmem:[#allocation6 + $0x200] sm:$0xff]  ;;  %v121_v8 = vld [vmem:[#allocation2 + $0x38] sm:$0xff] }
  0x43   :  { %380 = vmatpush.msrb.mxu2 %v230_v26  ;;  %399 = vmatpush.msrb.mxu3 %v247_v27  ;;  %v206_v6 = vld [vmem:[#allocation6 + $0x288] sm:$0xff]  ;;  %v237_v7 = vld [vmem:[#allocation6 + $0x380] sm:$0xff]  ;;  %v430_v10 = vld [vmem:[#allocation8 + $0x78] sm:$0xff] }
  0x44   :  { %340 = vmatpush.msrb.mxu0 %v198_v28  ;;  %359 = vmatpush.msrb.mxu1 %v215_v29  ;;  %v205_v9 = vld [vmem:[#allocation6 + $0x280] sm:$0xff]  ;;  %v429_v11 = vld [vmem:[#allocation8 + $0x70] sm:$0xff]  ;;  %v428_v12 = vld [vmem:[#allocation8 + $0x68] sm:$0xff] }
  0x45   :  { %381 = vmatpush.msrb.mxu2 %v229_v31  ;;  %400 = vmatpush.msrb.mxu3 %v246_v32  ;;  %v427_v13 = vld [vmem:[#allocation8 + $0x60] sm:$0xff]  ;;  %v425_v15 = vld [vmem:[#allocation8 + $0x50] sm:$0xff]  ;;  %v424_v16 = vld [vmem:[#allocation8 + $0x48] sm:$0xff] }
  0x46   :  { %341 = vmatpush.msrb.mxu0 %v197_v33  ;;  %360 = vmatpush.msrb.mxu1 %v214_v34  ;;  %v422_v18 = vld [vmem:[#allocation8 + $0x38] sm:$0xff]  ;;  %v421_v19 = vld [vmem:[#allocation8 + $0x30] sm:$0xff]  ;;  %v419_v21 = vld [vmem:[#allocation8 + $0x20] sm:$0xff] }
  0x47   :  { %382 = vmatpush.msrb.mxu2 %v228_v37  ;;  %401 = vmatpush.msrb.mxu3 %v245_v38  ;;  %v418_v22 = vld [vmem:[#allocation8 + $0x18] sm:$0xff]  ;;  %v416_v24 = vld [vmem:[#allocation8 + $0x8] sm:$0xff]  ;;  %v415_v25 = vld [vmem:[#allocation8] sm:$0xff] }
  0x48   :  { %342 = vmatpush.msrb.mxu0 %v196_v39  ;;  %361 = vmatpush.msrb.mxu1 %v213_v40  ;;  %v468_v26 = vld [vmem:[#allocation9 + $0x78] sm:$0xff]  ;;  %v467_v27 = vld [vmem:[#allocation9 + $0x70] sm:$0xff]  ;;  %v466_v28 = vld [vmem:[#allocation9 + $0x68] sm:$0xff] }
  0x49   :  { %383 = vmatpush.msrb.mxu2 %v227_v41  ;;  %402 = vmatpush.msrb.mxu3 %v244_v42  ;;  %v465_v29 = vld [vmem:[#allocation9 + $0x60] sm:$0xff]  ;;  %v463_v32 = vld [vmem:[#allocation9 + $0x50] sm:$0xff]  ;;  %v462_v33 = vld [vmem:[#allocation9 + $0x48] sm:$0xff] }
  0x4a   :  { %343 = vmatpush.msrb.mxu0 %v195_v43  ;;  %362 = vmatpush.msrb.mxu1 %v212_v46  ;;  %v519_v31 = vld [vmem:[#allocation11] ss:$0 sm:$0xff]  ;;  %v460_v38 = vld [vmem:[#allocation9 + $0x38] sm:$0xff]  ;;  %v459_v41 = vld [vmem:[#allocation9 + $0x30] sm:$0xff] }
  0x4b   :  { %384 = vmatpush.msrb.mxu2 %v226_v47  ;;  %403 = vmatpush.msrb.mxu3 %v243_v48  ;;  %v461_v36 = vld [vmem:[#allocation9 + $0x40] sm:$0xff]  ;;  %v458_v44 = vld [vmem:[#allocation9 + $0x28] sm:$0xff] }
  0x4c   :  { %344 = vmatpush.msrb.mxu0 %v194_v49  ;;  %363 = vmatpush.msrb.mxu1 %v211_v50  ;;  %v457_v46 = vld [vmem:[#allocation9 + $0x20] sm:$0xff]  ;;  %v456_v49 = vld [vmem:[#allocation9 + $0x18] sm:$0xff] }
  0x4d   :  { %385 = vmatpush.msrb.mxu2 %v225_v51  ;;  %404 = vmatpush.msrb.mxu3 %v242_v52 }
  0x4e   :  { %310 = vmatmul.f32.vlgmr.msra.gmra.mxu2 %v728_v14  ;;  %345 = vmatpush.msrb.mxu0 %v193_v53  ;;  %v426_v14 = vld [vmem:[#allocation8 + $0x58] sm:$0xff] }
  0x4f   :  { %364 = vmatpush.msrb.mxu1 %v210_v54  ;;  %386 = vmatpush.msrb.mxu2 %v224_v55 }
  0x50   :  { %405 = vmatpush.msrb.mxu3 %v241_v56  ;;  %270 = vmatmul.f32.vlgmr.msra.gmra.mxu0 %v730_v17  ;;  %v423_v17 = vld [vmem:[#allocation8 + $0x40] sm:$0xff] }
  0x51   :  { %330 = vmatmul.f32.vlgmr.msra.gmra.mxu3 %v732_v20  ;;  %346 = vmatpush.msrb.mxu0 %v192_v57  ;;  %v420_v20 = vld [vmem:[#allocation8 + $0x28] sm:$0xff]  ;;  %v455_v57 = vld [vmem:[#allocation9 + $0x10] sm:$0xff] }
  0x52   :  { %365 = vmatpush.msrb.mxu1 %v209_v58  ;;  %387 = vmatpush.msrb.mxu2 %v223_v59  ;;  %v454_v58 = vld [vmem:[#allocation9 + $0x8] sm:$0xff]  ;;  %v453_v59 = vld [vmem:[#allocation9] sm:$0xff] }
  0x53   :  { %406 = vmatpush.msrb.mxu3 %v240_v60  ;;  %290 = vmatmul.f32.vlgmr.msra.gmra.mxu1 %v734_v23  ;;  %v417_v23 = vld [vmem:[#allocation8 + $0x10] sm:$0xff]  ;;  %v520_v60 = vld [vmem:[#allocation11 + $0x1] ss:$0 sm:$0xff] }
  0x54   :  { %347 = vmatpush.msrb.mxu0 %v191_v61  ;;  %366 = vmatpush.msrb.mxu1 %v208_v62 }
  0x55   :  { %388 = vmatpush.msrb.mxu2 %v222_v63  ;;  %407 = vmatpush.msrb.mxu3 %v239_v0  ;;  %v521_v0 = vld [vmem:[#allocation11 + $0x2] ss:$0 sm:$0xff] }
  0x56   :  { %348 = vmatpush.msrb.mxu0 %v190_v1  ;;  %367 = vmatpush.msrb.mxu1 %v207_v2 }
  0x57   :  { %389 = vmatpush.msrb.mxu2 %v221_v3  ;;  %408 = vmatpush.msrb.mxu3 %v238_v4 }
  0x58   :  { %390 = vmatmul.f32.vlgmr.msrb.gmra.mxu2 %v736_v30  ;;  %349 = vmatpush.msrb.mxu0 %v189_v5  ;;  %v464_v30 = vld [vmem:[#allocation9 + $0x58] sm:$0xff] }
  0x59   :  { %368 = vmatpush.msrb.mxu1 %v206_v6  ;;  %409 = vmatpush.msrb.mxu3 %v237_v7 }
  0x5a   :  { %350 = vmatmul.f32.vlgmr.msrb.gmra.mxu0 %v738_v35  ;;  %410 = vmatmul.f32.vlgmr.msrb.gmra.mxu3 %v121_v8 }
  0x5b   :  { %369 = vmatpush.msrb.mxu1 %v205_v9  ;;  %432 = vmatpush.msra.mxu0 %v430_v10 }
  0x5c   :  { %370 = vmatmul.f32.vlgmr.msrb.gmra.mxu1 %v742_v45 }
  0x5d   :  { %433 = vmatpush.msra.mxu0 %v429_v11  ;;  %470 = vmatpush.msra.mxu1 %v468_v26 }
  0x5f   :  { %434 = vmatpush.msra.mxu0 %v428_v12  ;;  %471 = vmatpush.msra.mxu1 %v467_v27 }
  0x61   :  { %435 = vmatpush.msra.mxu0 %v427_v13  ;;  %472 = vmatpush.msra.mxu1 %v466_v28 }
  0x63   :  { %436 = vmatpush.msra.mxu0 %v426_v14  ;;  %473 = vmatpush.msra.mxu1 %v465_v29 }
  0x65   :  { %437 = vmatpush.msra.mxu0 %v425_v15  ;;  %474 = vmatpush.msra.mxu1 %v464_v30 }
  0x67   :  { %438 = vmatpush.msra.mxu0 %v424_v16  ;;  %475 = vmatpush.msra.mxu1 %v463_v32 }
  0x69   :  { %439 = vmatpush.msra.mxu0 %v423_v17  ;;  %476 = vmatpush.msra.mxu1 %v462_v33 }
  0x6b   :  { %440 = vmatpush.msra.mxu0 %v422_v18  ;;  %477 = vmatpush.msra.mxu1 %v461_v36 }
  0x6d   :  { %441 = vmatpush.msra.mxu0 %v421_v19  ;;  %478 = vmatpush.msra.mxu1 %v460_v38 }
  0x6f   :  { %442 = vmatpush.msra.mxu0 %v420_v20  ;;  %479 = vmatpush.msra.mxu1 %v459_v41 }
  0x71   :  { %443 = vmatpush.msra.mxu0 %v419_v21  ;;  %480 = vmatpush.msra.mxu1 %v458_v44 }
  0x73   :  { %444 = vmatpush.msra.mxu0 %v418_v22  ;;  %481 = vmatpush.msra.mxu1 %v457_v46 }
  0x75   :  { %445 = vmatpush.msra.mxu0 %v417_v23  ;;  %482 = vmatpush.msra.mxu1 %v456_v49 }
  0x77   :  { %446 = vmatpush.msra.mxu0 %v416_v24  ;;  %483 = vmatpush.msra.mxu1 %v455_v57 }
  0x79   :  { %447 = vmatpush.msra.mxu0 %v415_v25  ;;  %484 = vmatpush.msra.mxu1 %v454_v58 }
  0x7b   :  { %485 = vmatpush.msra.mxu1 %v453_v59 }
  0xcd   :  { %v271_v34 = vpop.f32.mrf.mxu0 }
  0xce   :  { %v272_v35 = vadd.f32 %v519_v31, %v271_v34 }
  0xd0   :  { %v291_v37 = vpop.f32.mrf.mxu1 }
  0xd1   :  { %v292_v39 = vadd.f32 %v291_v37, %v272_v35  ;;  %v311_v40 = vpop.f32.mrf.mxu2 }
  0xd3   :  { %v312_v42 = vadd.f32 %v311_v40, %v292_v39 }
  0xd4   :  { %v331_v43 = vpop.f32.mrf.mxu3 }
  0xd5   :  { %v332_v45 = vadd.f32 %v331_v43, %v312_v42 }
  0xd7   :  { %v351_v47 = vpop.f32.mrf.mxu0 }
  0xd8   :  { %v352_v48 = vadd.f32 %v351_v47, %v332_v45 }
  0xd9   :  { %v371_v50 = vpop.f32.mrf.mxu1 }
  0xda   :  { %v372_v51 = vadd.f32 %v371_v50, %v352_v48 }
  0xdb   :  { %v391_v52 = vpop.f32.mrf.mxu2 }
  0xdc   :  { %v392_v53 = vadd.f32 %v391_v52, %v372_v51 }
  0xdd   :  { %v411_v54 = vpop.f32.mrf.mxu3 }
  0xde   :  { %v412_v55 = vadd.f32 %v411_v54, %v392_v53 }
  0xe0   :  { %v414_v56 = vmax.f32 %v412_v55, 0.0 }
  0xe2   :  { %448 = vmatmul.f32.vlgmr.msra.gmra.mxu0 %v414_v56 }
 0x15f   :  { %v449_v61 = vpop.f32.mrf.mxu0 }
 0x160   :  { %v450_v62 = vadd.f32 %v520_v60, %v449_v61 }
 0x162   :  { %v452_v63 = vmax.f32 %v450_v62, 0.0 }
 0x164   :  { %486 = vmatmul.f32.vlgmr.msra.gmra.mxu1 %v452_v63 }
 0x1e1   :  { %v487_v1 = vpop.f32.mrf.mxu1 }
 0x1e2   :  { %v488_v2 = vadd.f32 %v521_v0, %v487_v1 }
 0x1e4   :  { %490 = vst [vmem:[#allocation12] sm:$0xff] %v488_v2 }
 0x1e5   :  { %501 = dma.vmem_to_hbm [thread:$0]  %s497_s4, 128, %s499_s19, [#allocation5]  }
 0x1e6   :  { %672 = dma.done.wait [#allocation5], 128  }
 0x1e7   :  { %673 = vsyncadd [#allocation5], 4294967168 }
 0x1e8   :  { %506 = vsyncpa [#allocation4], 1 }
 0x1e9   :  { %507 = vsyncpa [#allocation7], 1 }
 0x1ea   :  { %508 = vsyncpa [#allocation10], 1 }
 0x1eb   :  { %509 = vsyncpa [#allocation5], 1 }

</bundles_post_ra>
